<compile_context>
chip_gen: v7x
topology: tpu7x:2x2x1
jax: 0.10.0
libtpu: 0.0.40
codegen_flags: <defaults>
</compile_context>

<pallas_src>
import functools

import jax
import jax.numpy as jnp
from jax.experimental import pallas as pl
from jax.experimental.pallas import tpu as pltpu


def _backpain_kernel(xt_ref, w1_ref, b1_ref, w2_ref, b2_ref, w3_ref, b3_ref,
                     o_ref):
    # x tile, feature-major: (in_dim, TB), batch on lanes.
    xt = xt_ref[...].astype(jnp.bfloat16)

    # layer_1 + ReLU (bf16 MXU operands, f32 accumulate / epilogue)
    h = jnp.dot(w1_ref[...], xt, preferred_element_type=jnp.float32)   # (H, TB)
    h = jnp.maximum(h + b1_ref[...], 0.0)

    # layer_2 (batchnorm_1 pre-folded into W2/b2) + ReLU
    h = jnp.dot(w2_ref[...], h.astype(jnp.bfloat16),
                preferred_element_type=jnp.float32)                    # (H, TB)
    h = jnp.maximum(h + b2_ref[...], 0.0)

    # dropout: identity in eval mode.
    # layer_out (batchnorm_2 pre-folded into W3/b3) — lane-dense (out, TB) row.
    o = jnp.dot(w3_ref[...], h.astype(jnp.bfloat16),
                preferred_element_type=jnp.float32)                    # (O, TB)
    o_ref[...] = (o + b3_ref[...]).astype(o_ref.dtype)


@functools.partial(jax.jit, static_argnames=("tile_b",))
def backpain_forward(x, kparams, tile_b=128):
    """Fused BackPainNN forward. x: (B, input_size) f32 -> (B, output_size) f32."""
    w1, b1, w2, b2, w3, b3 = kparams
    B, in_dim = x.shape
    hidden = w1.shape[0]
    out_dim = w3.shape[0]

    num_tiles = pl.cdiv(B, tile_b)
    b_pad = num_tiles * tile_b

    # Feature-major layout: batch on the lane axis (lane-dense loads/stores).
    xt = x.T
    if b_pad != B:
        xt = jnp.pad(xt, ((0, 0), (0, b_pad - B)))

    resident = lambda shape: pl.BlockSpec(shape, lambda i: (0, 0))

    out_t = pl.pallas_call(
        _backpain_kernel,
        out_shape=jax.ShapeDtypeStruct((out_dim, b_pad), jnp.float32),
        grid=(num_tiles,),
        in_specs=[
            pl.BlockSpec((in_dim, tile_b), lambda i: (0, i)),  # x tile (batch on lanes)
            resident((hidden, in_dim)),                        # W1  (PyTorch (out,in) layout)
            resident((hidden, 1)),                             # b1
            resident((hidden, hidden)),                        # W2  (BN1 folded)
            resident((hidden, 1)),                             # b2  (BN1 folded)
            resident((out_dim, hidden)),                       # W3  (BN2 folded)
            resident((out_dim, 1)),                            # b3  (BN2 folded)
        ],
        out_specs=pl.BlockSpec((out_dim, tile_b), lambda i: (0, i)),
        compiler_params=pltpu.CompilerParams(
            dimension_semantics=("parallel",)),
    )(xt, w1, b1, w2, b2, w3, b3)

    return out_t.T[:B]                                          # (B, out_dim)


def init_raw_params(key, input_size, hidden_size, output_size):
    """Synthetic parameters in PyTorch layout: Linear weight (out, in), bias (out,)."""
    ks = jax.random.split(key, 10)

    def linear(kw, kb, fan_in, fan_out):
        bound = 1.0 / jnp.sqrt(fan_in)
        w = jax.random.uniform(kw, (fan_out, fan_in), jnp.float32, -bound, bound)
        b = jax.random.uniform(kb, (fan_out,), jnp.float32, -bound, bound)
        return w, b

    w1, b1 = linear(ks[0], ks[1], input_size, hidden_size)
    w2, b2 = linear(ks[2], ks[3], hidden_size, hidden_size)
    w3, b3 = linear(ks[4], ks[5], hidden_size, output_size)

    # BatchNorm1d(hidden_size): gamma, beta, running mean/var (eval mode).
    g1 = 1.0 + 0.1 * jax.random.normal(ks[6], (hidden_size,), jnp.float32)
    be1 = 0.05 * jax.random.normal(ks[7], (hidden_size,), jnp.float32)
    g2 = 1.0 - 0.1 * jax.random.normal(ks[8], (hidden_size,), jnp.float32)
    be2 = -0.03 * jax.random.normal(ks[9], (hidden_size,), jnp.float32)
    idx = jnp.arange(hidden_size, dtype=jnp.float32)
    m1 = 0.1 * jnp.sin(idx)
    v1 = 1.0 + 0.2 * jnp.cos(idx)
    m2 = -0.05 * jnp.cos(idx)
    v2 = 0.8 + 0.1 * jnp.sin(idx)
    return dict(w1=w1, b1=b1, w2=w2, b2=b2, w3=w3, b3=b3,
                g1=g1, be1=be1, m1=m1, v1=v1, g2=g2, be2=be2, m2=m2, v2=v2)


def fold_params(p, eps=1e-5):
    """Fold eval-mode BatchNorm1d into the *following* Linear; cast matmul
    operands to bf16 for the MXU (biases stay f32, shaped (out, 1))."""
    s1 = p["g1"] / jnp.sqrt(p["v1"] + eps)
    t1 = p["be1"] - p["m1"] * s1
    s2 = p["g2"] / jnp.sqrt(p["v2"] + eps)
    t2 = p["be2"] - p["m2"] * s2

    w1 = p["w1"]                                   # (H, in)
    b1 = p["b1"][:, None]                          # (H, 1)
    w2 = p["w2"] * s1[None, :]                     # scale input columns of layer_2
    b2 = (p["w2"] @ t1 + p["b2"])[:, None]         # (H, 1)
    w3 = p["w3"] * s2[None, :]                     # (O, H)
    b3 = (p["w3"] @ t2 + p["b3"])[:, None]         # (O, 1)

    return (w1.astype(jnp.bfloat16), b1,
            w2.astype(jnp.bfloat16), b2,
            w3.astype(jnp.bfloat16), b3)


def reference_forward(x, p, eps=1e-5):
    """Pure-JAX f32 reference mirroring the PyTorch eval-mode forward."""
    h = jnp.maximum(x @ p["w1"].T + p["b1"], 0.0)
    h = (h - p["m1"]) / jnp.sqrt(p["v1"] + eps) * p["g1"] + p["be1"]
    h = jnp.maximum(h @ p["w2"].T + p["b2"], 0.0)
    h = (h - p["m2"]) / jnp.sqrt(p["v2"] + eps) * p["g2"] + p["be2"]
    # dropout: identity in eval mode
    return h @ p["w3"].T + p["b3"]


def matched_reference(x, kparams):
    """Pure-JAX reference with the exact folded/bf16 numerics of the kernel."""
    w1, b1, w2, b2, w3, b3 = kparams
    xt = x.T.astype(jnp.bfloat16)
    h = jnp.maximum(jnp.dot(w1, xt, preferred_element_type=jnp.float32) + b1, 0.0)
    h = jnp.maximum(jnp.dot(w2, h.astype(jnp.bfloat16),
                            preferred_element_type=jnp.float32) + b2, 0.0)
    o = jnp.dot(w3, h.astype(jnp.bfloat16),
                preferred_element_type=jnp.float32) + b3
    return o.T


if __name__ == "__main__":
    # BackPainNN(input_size=12, hidden_size=64, output_size=1); hidden must be
    # 64 because the module hard-codes BatchNorm1d(64).
    INPUT_SIZE, HIDDEN_SIZE, OUTPUT_SIZE = 12, 64, 1
    BATCH, TILE_B = 256, 128          # grid of 2 batch-tiles; weights stay resident

    key = jax.random.PRNGKey(0)
    k_x, k_p = jax.random.split(key)
    x = jax.random.normal(k_x, (BATCH, INPUT_SIZE), jnp.float32)
    raw = init_raw_params(k_p, INPUT_SIZE, HIDDEN_SIZE, OUTPUT_SIZE)
    kparams = fold_params(raw)

    out = backpain_forward(x, kparams, tile_b=TILE_B)
    out = jax.block_until_ready(out)
    assert out.shape == (BATCH, OUTPUT_SIZE), out.shape

    # Tight check vs a pure-JAX reference with identical folded/bf16 numerics.
    ref_matched = matched_reference(x, kparams)
    err_matched = float(jnp.max(jnp.abs(out - ref_matched)))
    assert err_matched < 1e-3, err_matched

    # Sanity check vs the f32 eval-mode PyTorch semantics (difference is only
    # bf16 rounding of the matmul operands).
    ref_f32 = reference_forward(x, raw)
    err_f32 = float(jnp.max(jnp.abs(out - ref_f32)))
    assert err_f32 < 0.15, err_f32

    print("KERNEL_OK")
</pallas_src>

<mosaic_0001>
module attributes {stable_mosaic.version = 11 : i64} {
  func.func @_backpain_kernel(%arg0: i32, %arg1: memref<12x128xf32, #tpu.memory_space<vmem>>, %arg2: memref<64x12xbf16, #tpu.memory_space<vmem>>, %arg3: memref<64x1xf32, #tpu.memory_space<vmem>>, %arg4: memref<64x64xbf16, #tpu.memory_space<vmem>>, %arg5: memref<64x1xf32, #tpu.memory_space<vmem>>, %arg6: memref<1x64xbf16, #tpu.memory_space<vmem>>, %arg7: memref<1x1xf32, #tpu.memory_space<vmem>>, %arg8: memref<1x128xf32, #tpu.memory_space<vmem>>) attributes {dimension_semantics = [#tpu.dimension_semantics<parallel>], iteration_bounds = array<i64: 2>, scalar_prefetch = 0 : i64, scratch_operands = 0 : i64, tpu.core_type = #tpu.core_type<tc>, window_params = [{transform_indices = @transform_0, window_bounds = array<i64: 12, 128>}, {pipeline_mode = #tpu.pipeline_mode<synchronous>, transform_indices = @transform_1, window_bounds = array<i64: 64, 12>}, {pipeline_mode = #tpu.pipeline_mode<synchronous>, transform_indices = @transform_2, window_bounds = array<i64: 64, 1>}, {pipeline_mode = #tpu.pipeline_mode<synchronous>, transform_indices = @transform_3, window_bounds = array<i64: 64, 64>}, {pipeline_mode = #tpu.pipeline_mode<synchronous>, transform_indices = @transform_4, window_bounds = array<i64: 64, 1>}, {pipeline_mode = #tpu.pipeline_mode<synchronous>, transform_indices = @transform_5, window_bounds = array<i64: 1, 64>}, {pipeline_mode = #tpu.pipeline_mode<synchronous>, transform_indices = @transform_6, window_bounds = array<i64: 1, 1>}, {transform_indices = @transform_7, window_bounds = array<i64: 1, 128>}]} {
    %c0 = arith.constant 0 : index
    %c0_0 = arith.constant 0 : index
    %0 = vector.load %arg1[%c0, %c0_0] : memref<12x128xf32, #tpu.memory_space<vmem>>, vector<12x128xf32>
    %1 = arith.truncf %0 : vector<12x128xf32> to vector<12x128xbf16>
    %c0_1 = arith.constant 0 : index
    %c0_2 = arith.constant 0 : index
    %2 = vector.load %arg2[%c0_1, %c0_2] : memref<64x12xbf16, #tpu.memory_space<vmem>>, vector<64x12xbf16>
    %cst = arith.constant dense<0.000000e+00> : vector<64x128xf32>
    %3 = tpu.matmul %2, %1, %cst {dimension_numbers = #tpu.dot_dimension_numbers<[1], [0], [0], [1], [0, 0, 1, 1], [], []>} : vector<64x12xbf16>, vector<12x128xbf16>, vector<64x128xf32> -> vector<64x128xf32>
    %c0_3 = arith.constant 0 : index
    %c0_4 = arith.constant 0 : index
    %4 = vector.load %arg3[%c0_3, %c0_4] : memref<64x1xf32, #tpu.memory_space<vmem>>, vector<64x1xf32>
    %5 = vector.broadcast %4 : vector<64x1xf32> to vector<64x128xf32>
    %6 = arith.addf %3, %5 : vector<64x128xf32>
    %cst_5 = arith.constant 0.000000e+00 : f32
    %7 = vector.broadcast %cst_5 : f32 to vector<64x128xf32>
    %8 = arith.maximumf %6, %7 : vector<64x128xf32>
    %c0_6 = arith.constant 0 : index
    %c0_7 = arith.constant 0 : index
    %9 = vector.load %arg4[%c0_6, %c0_7] : memref<64x64xbf16, #tpu.memory_space<vmem>>, vector<64x64xbf16>
    %10 = arith.truncf %8 : vector<64x128xf32> to vector<64x128xbf16>
    %cst_8 = arith.constant dense<0.000000e+00> : vector<64x128xf32>
    %11 = tpu.matmul %9, %10, %cst_8 {dimension_numbers = #tpu.dot_dimension_numbers<[1], [0], [0], [1], [0, 0, 1, 1], [], []>} : vector<64x64xbf16>, vector<64x128xbf16>, vector<64x128xf32> -> vector<64x128xf32>
    %c0_9 = arith.constant 0 : index
    %c0_10 = arith.constant 0 : index
    %12 = vector.load %arg5[%c0_9, %c0_10] : memref<64x1xf32, #tpu.memory_space<vmem>>, vector<64x1xf32>
    %13 = vector.broadcast %12 : vector<64x1xf32> to vector<64x128xf32>
    %14 = arith.addf %11, %13 : vector<64x128xf32>
    %cst_11 = arith.constant 0.000000e+00 : f32
    %15 = vector.broadcast %cst_11 : f32 to vector<64x128xf32>
    %16 = arith.maximumf %14, %15 : vector<64x128xf32>
    %c0_12 = arith.constant 0 : index
    %c0_13 = arith.constant 0 : index
    %17 = vector.load %arg6[%c0_12, %c0_13] : memref<1x64xbf16, #tpu.memory_space<vmem>>, vector<1x64xbf16>
    %18 = arith.truncf %16 : vector<64x128xf32> to vector<64x128xbf16>
    %cst_14 = arith.constant dense<0.000000e+00> : vector<1x128xf32>
    %19 = tpu.matmul %17, %18, %cst_14 {dimension_numbers = #tpu.dot_dimension_numbers<[1], [0], [0], [1], [0, 0, 1, 1], [], []>} : vector<1x64xbf16>, vector<64x128xbf16>, vector<1x128xf32> -> vector<1x128xf32>
    %c0_15 = arith.constant 0 : index
    %c0_16 = arith.constant 0 : index
    %20 = vector.load %arg7[%c0_15, %c0_16] : memref<1x1xf32, #tpu.memory_space<vmem>>, vector<1x1xf32>
    %21 = vector.broadcast %20 : vector<1x1xf32> to vector<1x128xf32>
    %22 = arith.addf %19, %21 : vector<1x128xf32>
    %c0_17 = arith.constant 0 : index
    %c0_18 = arith.constant 0 : index
    %23 = vector.load %arg8[%c0_17, %c0_18] : memref<1x128xf32, #tpu.memory_space<vmem>>, vector<1x128xf32>
    tpu.vector_store %arg8[%c0_17, %c0_18], %22 {strides = array<i32>} : memref<1x128xf32, #tpu.memory_space<vmem>>, vector<1x128xf32>,
    return
  }
  func.func @transform_0(%arg0: i32) -> (i32, i32) {
    %c0_i32 = arith.constant 0 : i32
    %c0_i32_0 = arith.constant 0 : i32
    return %c0_i32, %arg0 : i32, i32
  }
  func.func @transform_1(%arg0: i32) -> (i32, i32) {
    %c0_i32 = arith.constant 0 : i32
    %c0_i32_0 = arith.constant 0 : i32
    %c0_i32_1 = arith.constant 0 : i32
    return %c0_i32, %c0_i32_0 : i32, i32
  }
  func.func @transform_2(%arg0: i32) -> (i32, i32) {
    %c0_i32 = arith.constant 0 : i32
    %c0_i32_0 = arith.constant 0 : i32
    %c0_i32_1 = arith.constant 0 : i32
    return %c0_i32, %c0_i32_0 : i32, i32
  }
  func.func @transform_3(%arg0: i32) -> (i32, i32) {
    %c0_i32 = arith.constant 0 : i32
    %c0_i32_0 = arith.constant 0 : i32
    %c0_i32_1 = arith.constant 0 : i32
    return %c0_i32, %c0_i32_0 : i32, i32
  }
  func.func @transform_4(%arg0: i32) -> (i32, i32) {
    %c0_i32 = arith.constant 0 : i32
    %c0_i32_0 = arith.constant 0 : i32
    %c0_i32_1 = arith.constant 0 : i32
    return %c0_i32, %c0_i32_0 : i32, i32
  }
  func.func @transform_5(%arg0: i32) -> (i32, i32) {
    %c0_i32 = arith.constant 0 : i32
    %c0_i32_0 = arith.constant 0 : i32
    %c0_i32_1 = arith.constant 0 : i32
    return %c0_i32, %c0_i32_0 : i32, i32
  }
  func.func @transform_6(%arg0: i32) -> (i32, i32) {
    %c0_i32 = arith.constant 0 : i32
    %c0_i32_0 = arith.constant 0 : i32
    %c0_i32_1 = arith.constant 0 : i32
    return %c0_i32, %c0_i32_0 : i32, i32
  }
  func.func @transform_7(%arg0: i32) -> (i32, i32) {
    %c0_i32 = arith.constant 0 : i32
    %c0_i32_0 = arith.constant 0 : i32
    return %c0_i32, %arg0 : i32, i32
  }
}

</mosaic_0001>

<bundles_post_ra>
// kernel: backpain_forward.1
= control target key start
LH: loop header
LB: loop body
LE: loop exit
PB: predicated region body
PF: predicated region fallthrough
CT: control target
= control target key end

     0   :  { %s1226_s0 = inlined_call_operand.vmem [shape: f32[12,256], index: 0, kind: input, shape index: {}]   ;;  %s1227_s1 = inlined_call_operand.vmem [shape: bf16[64,12], index: 1, kind: input, shape index: {}]   ;;  %s1228_s2 = inlined_call_operand.vmem [shape: f32[64,1], index: 2, kind: input, shape index: {}]   ;;  %s1229_s3 = inlined_call_operand.vmem [shape: bf16[64,64], index: 3, kind: input, shape index: {}]   ;;  %s1230_s4 = inlined_call_operand.vmem [shape: f32[64,1], index: 4, kind: input, shape index: {}]   ;;  %s1231_s5 = inlined_call_operand.vmem [shape: bf16[1,64], index: 5, kind: input, shape index: {}]   ;;  %s1232_s6 = inlined_call_operand.<no memory space> [shape: f32[1,1], index: 6, kind: input, shape index: {}]   ;;  %s1233_s7 = inlined_call_operand.hbm [shape: f32[1,256], index: 7, kind: output, shape index: {}]  }
   0x1   :  { %v12_v0 = vstv %s1232_s6 }
   0x2   :  { %13 = vst [vmem:[#allocation2] sm:$0x1] %v12_v0 }
   0x3   :  { %14 = vsyncpa [#allocation5], 0 }
   0x4   :  { %16 = vsyncpa [#allocation5 + $0x1], 0  ;;  %s1032_s26 = smov 0   ;;  %s1034_s27 = smov 0  }
   0x5   :  { %s1036_s28 = smov 0   ;;  %s1038_s29 = smov 0  }
   0x6 LB: > { %s784_s6 = sadd.s32 4294967295, %s983_s29   ;;  %s785_s30 = sadd.s32 4294967294, %s983_s29   ;;  %s983_s29 = sphi %s1038_s29, %s1239_s29   ;;  %s979_s28 = sphi %s1036_s28, %s1238_s28   ;;  %s975_s27 = sphi %s1034_s27, %s1237_s27   ;;  %s971_s26 = sphi %s1032_s26, %s1236_s26  }
   0x7   : > { %s1055_s8 = sadd.s32 1, %s983_s29   ;;  %s29_s9 = sadd.s32 1, %s979_s28 }
   0x8   : > { %s26_s10 = ssub.s32 %s983_s29, %s1055_s8  ;;  %p36_p0 = scmp.ne.s32.totalorder %s979_s28, %s975_s27 }
   0x9   : > { %p27_p1 = scmp.eq.s32.totalorder %s26_s10, 0  ;;  %p37_p2 = scmp.eq.s32.totalorder %s983_s29, 0 }
   0xa   : > { %p192_p3 = scmp.eq.s32.totalorder %s784_s6, 1  ;;  %p197_p4 = scmp.ne.s32.totalorder %s975_s27, %s971_s26 }
   0xb   : > { %s1068_s11 = scalar_select %p27_p1, %s979_s28, %s29_s9  }
   0xc   : > { %p38_p5 = por %p37_p2, %p36_p0  ;;  %p1070_p6 = por %p192_p3, %p36_p0 }
   0xd   : > { %p198_p7 = scmp.eq.s32.totalorder %s785_s30, 1  ;;  %p787_p9 = scmp.ge.s32.totalorder %s983_s29, 2 }
   0xf   : > { %p1074_p8 = por %p198_p7, %p197_p4  ;;  %232 = sbr.rel (%p787_p9) target bundleno = 29 (0x1d), region = 40 }
  0x16   : > { %235 = sbr.rel (!%p38_p5) target bundleno = 29 (0x1d), region = 44  ;;  %s237_s14 = sand.u32 (%p38_p5), 1, %s979_s28  }
  0x17   : > { %s789_s15 = sshll.u32 (%p38_p5), %s983_s29, 3  ;;  %s788_s16 = sshll.u32 (%p38_p5), %s237_s14, 4 }
  0x18   : > { %s241_s19 = scalar_lea.vmem (%p38_p5), %s1226_s0, %s789_s15  ;;  %s239_s20 = scalar_lea.vmem (%p38_p5), [#allocation3], %s788_s16 }
  0x19   : > { %v271_v1 = vld [vmem:[%s241_s19] sm:$0xff] (%p38_p5)  ;;  %v273_v2 = vld [vmem:[%s241_s19 + $0x10] sm:$0xff] (%p38_p5) }
  0x1a   : > { %272 = vst [vmem:[%s239_s20] sm:$0xff] (%p38_p5), %v271_v1  ;;  %274 = vst [vmem:[%s239_s20 + $0x8] sm:$0xff] (%p38_p5), %v273_v2 }
  0x1d PF: > { %p790_p10 = scmp.ge.s32.totalorder %s983_s29, 1  ;;  %p279_p11 = scmp.lt.s32.totalorder %s983_s29, 3 }
  0x1f   : > { %p280_p12 = pnand %p790_p10, %p279_p11 }
  0x20   : > { %s1089_s21 = sand.u32 (!%p280_p12), 1, %s975_s27   ;;  %v913_v3 = vld [vmem:[%s1227_s1] sm:$0xff] (!%p280_p12)   ;;  %vm396_vm0 = vcmask (!%p280_p12), 97280   ;;  %vm409_vm1 = vcmask (!%p280_p12), 1045504   ;;  %v985_v7 = vmov (!%p280_p12), 0   ;;  %v330_v9 = vld [vmem:[%s1228_s2 + $0x10] sm:$0xff] (!%p280_p12) }
  0x21   : > { %283 = sbr.rel (%p280_p12) target bundleno = 743 (0x2e7), region = 82  ;;  %s791_s22 = sshll.u32 (!%p280_p12), %s1089_s21, 4  ;;  %832 = vmatprep.mubr.msk.bf16.mxu0 (!%p280_p12), %vm396_vm0, %v913_v3  ;;  %911 = vset.pattern.permute.xlu0 (!%p280_p12), %v985_v7  ;;  %v328_v8 = vld [vmem:[%s1228_s2] sm:$0xff] (!%p280_p12)  ;;  %v914_v11 = vld [vmem:[%s1227_s1 + $0x8] sm:$0xff] (!%p280_p12)   ;;  %v915_v12 = vld [vmem:[%s1227_s1 + $0x10] sm:$0xff] (!%p280_p12)   ;;  %vm566_vm2 = vcmask (!%p280_p12), 523264  }
  0x22   : > { %s288_s25 = scalar_lea.vmem (!%p280_p12), [#allocation3], %s791_s22  ;;  %912 = vset.pattern.permute.xlu1 (!%p280_p12), %v985_v7  ;;  %338 = vperm.xlu0 (!%p280_p12), %911, %v328_v8   ;;  %v329_v13 = vld [vmem:[%s1228_s2 + $0x8] sm:$0xff] (!%p280_p12)  ;;  %v331_v14 = vld [vmem:[%s1228_s2 + $0x18] sm:$0xff] (!%p280_p12)  ;;  %v332_v15 = vld [vmem:[%s1228_s2 + $0x20] sm:$0xff] (!%p280_p12)  ;;  %vm987_vm3 = vmmov (!%p280_p12), 0   ;;  %s809_s17 = sshll.u32 (!%p280_p12), %s784_s6, 4 }
  0x23   : > { %v317_v4 = vld [vmem:[%s288_s25] sm:$0xff] (!%p280_p12)  ;;  %v318_v5 = vld [vmem:[%s288_s25 + $0x8] sm:$0xf] (!%p280_p12)  ;;  %348 = vperm.xlu1 (!%p280_p12), %912, %v330_v9   ;;  %v657_v28 = vld [vmem:[#allocation2] sm:$0x1] (!%p280_p12)  ;;  %s315_s18 = scalar_lea.vmem (!%p280_p12), [#allocation4], %s1089_s21  ;;  %s1182_s23 = scalar_lea.hbm (!%p280_p12), %s1233_s7, %s809_s17 }
  0x24   : > { %v319_v6 = vpack.c.bf16 (!%p280_p12), %v318_v5, %v317_v4  ;;  %v333_v16 = vld [vmem:[%s1228_s2 + $0x28] sm:$0xff] (!%p280_p12)  ;;  %v916_v17 = vld [vmem:[%s1227_s1 + $0x18] sm:$0xff] (!%p280_p12)   ;;  %v334_v18 = vld [vmem:[%s1228_s2 + $0x30] sm:$0xff] (!%p280_p12)  ;;  %v986_v5 = vmov (!%p280_p12), 0.0   ;;  %s724_s19 = sshll.u32 (!%p280_p12), %s315_s18, 4  ;;  %s712_s6 = scalar_lea.sflag (!%p280_p12), [#allocation5], %s1089_s21  ;;  %s1184_s19 = int_to_ptr.vmem [resolvable:$true] %s724_s19 }
  0x25   : > { %v335_v19 = vld [vmem:[%s1228_s2 + $0x38] sm:$0xff] (!%p280_p12)  ;;  %v498_v20 = vld [vmem:[%s1230_s4] sm:$0xff] (!%p280_p12)  ;;  %v499_v21 = vld [vmem:[%s1230_s4 + $0x8] sm:$0xff] (!%p280_p12)  ;;  %s921_s24 = scalar_lea.vmem (!%p280_p12), %s1184_s19, 16  ;;  %s988_s25 = smov (!%p280_p12), [#allocation4]  }
  0x26   : > { %868 = vmatprep.subr.msk.bf16.mxu0 (!%p280_p12), %vm409_vm1, %v319_v6  ;;  %v411_v10 = vsel (!%p280_p12), %vm409_vm1, %v319_v6, 0  ;;  %343 = vperm.xlu0 (!%p280_p12), %911, %v329_v13   ;;  %v500_v22 = vld [vmem:[%s1230_s4 + $0x10] sm:$0xff] (!%p280_p12)  ;;  %v501_v23 = vld [vmem:[%s1230_s4 + $0x18] sm:$0xff] (!%p280_p12)  ;;  %v502_v24 = vld [vmem:[%s1230_s4 + $0x20] sm:$0xff] (!%p280_p12)  ;;  %p922_p13 = scmp.ne.s32.totalorder (!%p280_p12), %s1184_s19, %s921_s24  ;;  %s925_s30 = sshll.u32 (!%p280_p12), %s988_s25, 4  ;;  %s926_s30 = int_to_ptr.vmem [resolvable:$false] %s925_s30 }
  0x27   : > { %831 = vmatpush3.bf16.msra.mxu0 (!%p280_p12), %v411_v10  ;;  %353 = vperm.xlu1 (!%p280_p12), %912, %v331_v14   ;;  %v503_v25 = vld [vmem:[%s1230_s4 + $0x28] sm:$0xff] (!%p280_p12)  ;;  %v504_v26 = vld [vmem:[%s1230_s4 + $0x30] sm:$0xff] (!%p280_p12)  ;;  %v505_v27 = vld [vmem:[%s1230_s4 + $0x38] sm:$0xff] (!%p280_p12)  ;;  %s927_s9 = scalar_lea.vmem (!%p280_p12), %s926_s30, 32  ;;  %p928_p2 = scmp.lt.s32.totalorder (!%p280_p12), %s1184_s19, %s926_s30 }
  0x28   : > { %v917_v29 = vld [vmem:[%s1229_s3] sm:$0xff]   ;;  %v918_v2 = vld [vmem:[%s1229_s3 + $0x8] sm:$0xff]   ;;  %v919_v3 = vld [vmem:[%s1229_s3 + $0x10] sm:$0xff]   ;;  %856 = vmatprep.subr.bf16.mxu0 %v986_v5  ;;  %p923_p0 = pnand %p922_p13, %p1070_p6  ;;  %p929_p3 = scmp.lt.s32.totalorder %s927_s9, %s921_s24 }
  0x29   : > { %848 = vmatprep.mubr.msk.bf16.mxu1 %vm566_vm2, %v917_v29  ;;  %v920_v4 = vld [vmem:[%s1229_s3 + $0x18] sm:$0xff]  }
  0x2a   : > { %833 = vmatmul.mubr.msk.bf16.vlgmr.msra.gmra.mrb[0].mxu0 %vm396_vm0, %v914_v11  ;;  %358 = vperm.xlu0 %911, %v332_v15   ;;  %p924_p1 = pneg %p923_p0  ;;  %p930_p4 = por %p929_p3, %p928_p2 }
  0x2b   : > { %836 = vmatprep.mubr.msk.bf16.mxu0 %vm396_vm0, %v915_v12  ;;  %363 = vperm.xlu1 %912, %v333_v16  }
  0x2c   : > { %p931_p5 = pnand %p930_p4, %p924_p1 }
  0x2e   : > { %368 = vperm.xlu0 %911, %v334_v18  }
  0x2f   : > { %373 = vperm.xlu1 %912, %v335_v19  }
  0x32   : > { %837 = vmatmul.mubr.msk.bf16.gmra.mrb[4].mxu0 %vm396_vm0, %v916_v17  ;;  %508 = vperm.xlu0 %911, %v498_v20  }
  0x33   : > { %513 = vperm.xlu1 %912, %v499_v21   ;;  %864 = vmatprep.mubr.msk.bf16.mxu0 %vm987_vm3, %v986_v5 }
  0x36   : > { %518 = vperm.xlu0 %911, %v500_v22  }
  0x37   : > { %523 = vperm.xlu1 %912, %v501_v23  }
  0x3a   : > { %528 = vperm.xlu0 %911, %v502_v24  }
  0x3b   : > { %533 = vperm.xlu1 %912, %v503_v25  }
  0x3e   : > { %538 = vperm.xlu0 %911, %v504_v26  }
  0x3f   : > { %543 = vperm.xlu1 %912, %v505_v27  }
  0x42   : > { %660 = vperm.xlu0 %911, %v657_v28  }
  0xa1   : > { %v339_v30 = vpop.permute.xlu0 %338 }
  0xa2   : > { %v349_v31 = vpop.permute.xlu1 %348 }
  0xa5   : > { %v344_v32 = vpop.permute.xlu0 %343 }
  0xa6   : > { %v354_v33 = vpop.permute.xlu1 %353 }
  0xa9   : > { %v359_v37 = vpop.permute.xlu0 %358 }
  0xaa   : > { %v364_v42 = vpop.permute.xlu1 %363 }
  0xad   : > { %v369_v49 = vpop.permute.xlu0 %368 }
  0xae   : > { %v374_v54 = vpop.permute.xlu1 %373 }
  0xb1   : > { %v509_v6 = vpop.permute.xlu0 %508 }
  0xb2   : > { %v514_v7 = vpop.permute.xlu1 %513 }
  0xb5   : > { %v519_v8 = vpop.permute.xlu0 %518 }
  0xb6   : > { %v524_v9 = vpop.permute.xlu1 %523 }
  0xb9   : > { %v529_v13 = vpop.permute.xlu0 %528 }
  0xba   : > { %v534_v18 = vpop.permute.xlu1 %533 }
  0xbd   : > { %v539_v25 = vpop.permute.xlu0 %538 }
  0xfd   : > { %v834_v34 = vpop.f32.mrb[0].mxu0 }
  0xfe   : > { %v456_v35 = vadd.f32 %v834_v34, %v349_v31  ;;  %v447_v36 = vpop.f32.mrb[1].mxu0 }
  0xff   : > { %v448_v38 = vadd.f32 %v447_v36, %v339_v30  ;;  %v835_v39 = vpop.f32.mrb[2].mxu0  ;;  %v544_v30 = vpop.permute.xlu1 %543 }
 0x100   : > { %v459_v40 = vadd.f32 %v835_v39, %v354_v33  ;;  %v450_v41 = vpop.f32.mrb[3].mxu0  ;;  %v480_v44 = vmax.f32 %v456_v35, 0.0 }
 0x101   : > { %v451_v43 = vadd.f32 %v450_v41, %v344_v32  ;;  %v478_v46 = vmax.f32 %v448_v38, 0.0 }
 0x102   : > { %v481_v45 = vmax.f32 %v459_v40, 0.0 }
 0x103   : > { %v479_v47 = vmax.f32 %v451_v43, 0.0  ;;  %v663_v43 = vlaneseq }
 0x104   : > { %v495_v48 = vpack.c.bf16 %v481_v45, %v480_v44 }
 0x105   : > { %v838_v50 = vpop.f32.mrb[4].mxu0  ;;  %v494_v51 = vpack.c.bf16 %v479_v47, %v478_v46  ;;  %v664_v44 = vshrl.u32 %v663_v43, 7  ;;  %v661_v46 = vpop.permute.xlu0 %660 }
 0x106   : > { %v472_v52 = vadd.f32 %v838_v50, %v369_v49  ;;  %v463_v53 = vpop.f32.mrb[5].mxu0 }
 0x107   : > { %v464_v55 = vadd.f32 %v463_v53, %v359_v37  ;;  %v839_v56 = vpop.f32.mrb[6].mxu0  ;;  %840 = vmatprep.subr.bf16.mxu1 %v494_v51  ;;  %v665_v45 = vsub.s32 0, %v664_v44 }
 0x108   : > { %v475_v57 = vadd.f32 %v839_v56, %v374_v54  ;;  %v466_v58 = vpop.f32.mrb[7].mxu0  ;;  %841 = vmatpush3.bf16.msra.mxu1 %v494_v51  ;;  %v484_v60 = vmax.f32 %v472_v52, 0.0 }
 0x109   : > { %v467_v59 = vadd.f32 %v466_v58, %v364_v42  ;;  %842 = vmatprep.subr.bf16.mxu1 %v495_v48  ;;  %v482_v62 = vmax.f32 %v464_v55, 0.0  ;;  %v652_v42 = vld [vmem:[%s1231_s5] sm:$0x1]  ;;  %v666_v47 = vrot.slane %v661_v46, %v665_v45 }
 0x10a   : > { %v485_v61 = vmax.f32 %v475_v57, 0.0 }
 0x10b   : > { %v483_v63 = vmax.f32 %v467_v59, 0.0 }
 0x10c   : > { %v497_v0 = vpack.c.bf16 %v485_v61, %v484_v60  ;;  %843 = vmatpush3.bf16.msra.mxu1 %v495_v48 }
 0x10d   : > { %v496_v1 = vpack.c.bf16 %v483_v63, %v482_v62 }
 0x10f   : > { %844 = vmatprep.subr.bf16.mxu1 %v496_v1 }
 0x110   : > { %845 = vmatpush3.bf16.msra.mxu1 %v496_v1 }
 0x111   : > { %846 = vmatprep.subr.bf16.mxu1 %v497_v0 }
 0x114   : > { %847 = vmatpush3.bf16.msra.mxu1 %v497_v0 }
 0x117   : > { %849 = vmatmul.mubr.msk.bf16.vlgmr.msra.gmra.mrb[0].mxu1 %vm566_vm2, %v918_v2 }
 0x118   : > { %852 = vmatprep.mubr.msk.bf16.mxu1 %vm566_vm2, %v919_v3 }
 0x11f   : > { %853 = vmatmul.mubr.msk.bf16.gmra.mrb[4].mxu1 %vm566_vm2, %v920_v4 }
 0x1ea   : > { %v850_v10 = vpop.f32.mrb[0].mxu1 }
 0x1eb   : > { %v622_v11 = vadd.f32 %v850_v10, %v519_v8  ;;  %v613_v12 = vpop.f32.mrb[1].mxu1 }
 0x1ec   : > { %v614_v14 = vadd.f32 %v613_v12, %v509_v6  ;;  %v851_v15 = vpop.f32.mrb[2].mxu1 }
 0x1ed   : > { %v625_v16 = vadd.f32 %v851_v15, %v524_v9  ;;  %v616_v17 = vpop.f32.mrb[3].mxu1  ;;  %v646_v20 = vmax.f32 %v622_v11, 0.0 }
 0x1ee   : > { %v617_v19 = vadd.f32 %v616_v17, %v514_v7  ;;  %v644_v22 = vmax.f32 %v614_v14, 0.0 }
 0x1ef   : > { %v647_v21 = vmax.f32 %v625_v16, 0.0 }
 0x1f0   : > { %v645_v23 = vmax.f32 %v617_v19, 0.0 }
 0x1f1   : > { %v654_v24 = vpack.c.bf16 %v647_v21, %v646_v20 }
 0x1f2   : > { %v653_v26 = vpack.c.bf16 %v645_v23, %v644_v22  ;;  %v854_v27 = vpop.f32.mrb[4].mxu1 }
 0x1f3   : > { %v638_v28 = vadd.f32 %v854_v27, %v539_v25  ;;  %v629_v29 = vpop.f32.mrb[5].mxu1 }
 0x1f4   : > { %v630_v31 = vadd.f32 %v629_v29, %v529_v13  ;;  %v855_v32 = vpop.f32.mrb[6].mxu1  ;;  %857 = vmatpush3.bf16.msra.mxu0 %v653_v26 }
 0x1f5   : > { %v641_v33 = vadd.f32 %v855_v32, %v544_v30  ;;  %v632_v34 = vpop.f32.mrb[7].mxu1  ;;  %858 = vmatprep.subr.bf16.mxu0 %v986_v5  ;;  %v650_v36 = vmax.f32 %v638_v28, 0.0 }
 0x1f6   : > { %v633_v35 = vadd.f32 %v632_v34, %v534_v18  ;;  %v648_v38 = vmax.f32 %v630_v31, 0.0 }
 0x1f7   : > { %v651_v37 = vmax.f32 %v641_v33, 0.0 }
 0x1f8   : > { %v649_v39 = vmax.f32 %v633_v35, 0.0  ;;  %859 = vmatpush3.bf16.msra.mxu0 %v654_v24 }
 0x1f9   : > { %v656_v40 = vpack.c.bf16 %v651_v37, %v650_v36  ;;  %860 = vmatprep.subr.bf16.mxu0 %v986_v5 }
 0x1fa   : > { %v655_v41 = vpack.c.bf16 %v649_v39, %v648_v38 }
 0x1fc   : > { %861 = vmatpush3.bf16.msra.mxu0 %v655_v41 }
 0x1fd   : > { %862 = vmatprep.subr.bf16.mxu0 %v986_v5 }
 0x200   : > { %863 = vmatpush3.bf16.msra.mxu0 %v656_v40 }
 0x203   : > { %865 = vmatmul.mubr.msk.bf16.vlgmr.msra.gmra.mrb[8].mxu0 %vm566_vm2, %v652_v42 }
 0x2d6   : > { %v704_v48 = vpop.f32.mrb[8].mxu0 }
 0x2d7   : > { %v705_v49 = vadd.f32 %v704_v48, %v666_v47  ;;  %v866_v50 = vpop.f32.mrb[9].mxu0 }
 0x2d8   : > { %v707_v51 = vpop.f32.mrb[10].mxu0 }
 0x2d9   : > { %710 = vst [vmem:[%s315_s18] sm:$0x1] %v705_v49  ;;  %v867_v52 = vpop.f32.mrb[11].mxu0 }
 0x2da   : > { %934 = shalt.err (!%p931_p5)
}
 0x2db   : > { %s935_s21 = scalar_lea.hbm %s1182_s23, 16  ;;  %s939_s15 = scalar_lea.hbm %s1233_s7, 32 }
 0x2dc   : > { %p936_p7 = scmp.ne.s32.totalorder %s1182_s23, %s935_s21  ;;  %p940_p12 = scmp.lt.u32.totalorder %s1182_s23, %s1233_s7 }
 0x2dd   : > { %p941_p13 = scmp.lt.u32.totalorder %s939_s15, %s935_s21  ;;  %p943_p1 = scmp.lt.u32.totalorder %s935_s21, %s1182_s23 }
 0x2de   : > { %p937_p10 = pnand %p936_p7, %p1070_p6 }
 0x2df   : > { %p942_p0 = por %p941_p13, %p940_p12 }
 0x2e0   : > { %p938_p11 = pneg %p937_p10 }
 0x2e1   : > { %p944_p2 = por %p943_p1, %p942_p0 }
 0x2e3   : > { %p945_p3 = pnand %p944_p2, %p938_p11 }
 0x2e5   : > { %948 = shalt.err (!%p945_p3)
}
 0x2e6   : > { %869 = dma.vmem_to_hbm [thread:$0]  (%p1070_p6), %s1184_s19, 16, %s1182_s23, %s712_s6  }
 0x2e7 PF: > { %s736_s18 = sand.u32 1, %s971_s26   ;;  %p872_p4 = pnand %p787_p9, %p1074_p8 }
 0x2e8   : > { %s737_s20 = scalar_lea.sflag [#allocation5], %s736_s18 }
 0x2e9   : > { %966 = dma.done.wait (!%p872_p4), %s737_s20, 16  }
 0x2ea   : > { %968 = vsyncadd (!%p872_p4), %s737_s20, 4294967280  ;;  %p19_p5 = scmp.ge.s32.totalorder %s1055_s8, 4   ;;  %s1236_s26 = smov %s975_s27 }
 0x2eb   : > { %s1237_s27 = smov %s979_s28  ;;  %s1238_s28 = smov %s1068_s11 }
 0x2ec   : > { %s1239_s29 = smov %s1055_s8  ;;  %21 = sbr.rel (!%p19_p5) target bundleno = 6 (0x6), region = 126 }
 0x2f3   :  { %741 = vsyncpa [#allocation5], 1 }
 0x2f4   :  { %743 = vsyncpa [#allocation5 + $0x1], 1 }

</bundles_post_ra>
